<compile_context>
chip_gen: v6e
topology: v6e:2x2x1
jax: 0.10.0
libtpu: 0.0.40
codegen_flags: <defaults>
</compile_context>

<pallas_src>
import numpy as np
import jax
import jax.numpy as jnp
from jax import lax
from jax.experimental import pallas as pl
from jax.experimental.pallas import tpu as pltpu

D_CONST = 256  # self.d in the PyTorch module


def construct_log_spaced_freqs(max_num_frames: int, skip_small_t_freqs: int = 0) -> jnp.ndarray:
    time_resolution = 2 ** np.ceil(np.log2(max_num_frames))
    num_fourier_feats = int(np.ceil(np.log2(time_resolution)))
    powers = 2.0 ** np.arange(num_fourier_feats)
    powers = powers[: len(powers) - skip_small_t_freqs]
    fourier_coefs = powers[None, :].astype(np.float32) * np.pi
    return jnp.asarray(fourier_coefs / time_resolution, dtype=jnp.float32)  # [1, F]


def _round_up(x: int, m: int) -> int:
    return ((x + m - 1) // m) * m


def _cdiv(a: int, b: int) -> int:
    return (a + b - 1) // b


def _make_tde_kernel(coef_list, d_const, f):
    """Build the kernel with fourier coefficients baked in as float immediates."""
    coef_list = [float(c) for c in coef_list]
    assert len(coef_list) == f

    def kernel(td_ref, table_ref, out_ref):
        # td_ref    : VMEM (TILE, 1)       float32 raw time difference per row
        # table_ref : VMEM (M, d_const)    float32 whole embedding table (resident)
        # out_ref   : VMEM (TILE, d_const + 2F)
        tile = td_ref.shape[0]
        m = table_ref.shape[0]
        td = td_ref[...]                                                    # (TILE, 1)

        # --- embedding index from the raw diff (round + clamp; caller invariant
        #     is that diffs are valid rows, clamp only guards OOB) ---
        idx = jnp.clip(jnp.round(td), 0.0, float(m - 1)).astype(jnp.int32)  # (TILE, 1)

        # --- embedding gather via one-hot MXU matmul (exact: precision=HIGHEST) ---
        frame_ids = lax.broadcasted_iota(jnp.int32, (tile, m), 1)           # (TILE, M)
        one_hot = (idx == frame_ids).astype(jnp.float32)                    # (TILE, M)
        embs = jnp.dot(one_hot, table_ref[...],
                       preferred_element_type=jnp.float32,
                       precision=jax.lax.Precision.HIGHEST)                 # (TILE, 256)

        # --- Fourier features; coefficients folded to immediates ---
        raw = jnp.concatenate([td * c for c in coef_list], axis=-1)         # (TILE, F)

        # --- direct slice stores (no output-sized concatenate / temporary) ---
        out_ref[:, :d_const] = embs                                          # unmasked (256 lanes)
        out_ref[:, d_const:d_const + f] = jnp.sin(raw)
        out_ref[:, d_const + f:] = jnp.cos(raw)

    return kernel


def temporal_difference_encoder(t, emb_table, fourier_coefs, num_frames_per_video,
                                sampling_type="random", max_tile=1024,
                                min_rows_for_pallas=2048):
    """JAX/Pallas equivalent of TemporalDifferenceEncoder.forward."""
    B = t.shape[0]
    t = t.astype(jnp.float32)

    if num_frames_per_video == 1:
        return jnp.zeros((B, 1), dtype=jnp.float32)

    if sampling_type == "uniform":
        num_diffs = 1
        t_diffs = (t[:, 1] - t[:, 0]).reshape(-1)
    else:
        num_diffs = num_frames_per_video - 1
        t_diffs = (t[:, 1:] - t[:, :-1]).reshape(-1)

    M, d_const = emb_table.shape
    F = fourier_coefs.shape[1]
    D = d_const + 2 * F
    N = t_diffs.shape[0]

    t_diffs = t_diffs.astype(jnp.float32)
    emb_table = emb_table.astype(jnp.float32)
    coef_list = np.asarray(fourier_coefs, dtype=np.float32).reshape(-1).tolist()

    if N < min_rows_for_pallas:
        # Small-N fast path: pallas_call launch + pipeline prologue + tile
        # padding dwarf the ~1 KiB of real work; plain XLA fusion wins here.
        idx = jnp.clip(jnp.round(t_diffs).astype(jnp.int32), 0, M - 1)
        const_embs = jnp.take(emb_table, idx, axis=0)                        # (N, 256)
        raw = t_diffs[:, None] * jnp.asarray(fourier_coefs, jnp.float32)     # (N, F)
        out = jnp.concatenate([const_embs, jnp.sin(raw), jnp.cos(raw)], axis=1)
        return out.reshape(B, num_diffs * D)

    # Adaptive tiling: bound padding waste and, for large N, keep >= 2 grid
    # steps so v7x can split the "parallel" row axis across its 2 TensorCores.
    nt = max(_cdiv(N, max_tile), min(2, _cdiv(N, 8)))
    tile = _round_up(_cdiv(N, nt), 8)
    n_pad = nt * tile
    td_p = jnp.pad(t_diffs, (0, n_pad - N)).reshape(n_pad, 1)

    kernel = _make_tde_kernel(coef_list, d_const, F)

    # NOTE: at large max_num_frames the resident table BlockSpec could be
    # single-buffered (pipeline_mode=pl.Buffered(1)) and vmem_limit_bytes
    # raised; at M=16 (16 KiB) this is irrelevant.
    out_rows = pl.pallas_call(
        kernel,
        out_shape=jax.ShapeDtypeStruct((n_pad, D), jnp.float32),
        grid_spec=pltpu.PrefetchScalarGridSpec(
            num_scalar_prefetch=0,
            grid=(nt,),
            in_specs=[
                pl.BlockSpec((tile, 1), lambda i: (i, 0)),        # t_diffs
                pl.BlockSpec((M, d_const), lambda i: (0, 0)),     # embedding table (resident)
            ],
            out_specs=pl.BlockSpec((tile, D), lambda i: (i, 0)),
        ),
        compiler_params=pltpu.CompilerParams(
            dimension_semantics=("parallel",),                    # shard row tiles across TCs on v7x
        ),
    )(td_p, emb_table)

    # .view(B, num_diffs, -1).view(B, -1)
    return out_rows[:N].reshape(B, num_diffs * D)


def _reference(t, emb_table, fourier_coefs, num_frames_per_video, sampling_type="random"):
    """Pure-JAX reference mirroring the PyTorch forward."""
    B = t.shape[0]
    t = t.astype(jnp.float32)
    if num_frames_per_video == 1:
        return jnp.zeros((B, 1), dtype=jnp.float32)
    if sampling_type == "uniform":
        t_diffs = (t[:, 1] - t[:, 0]).reshape(-1)
    else:
        t_diffs = (t[:, 1:] - t[:, :-1]).reshape(-1)
    idx = jnp.round(t_diffs).astype(jnp.int32)
    const_embs = emb_table[idx]                                   # [N, 256]
    raw = t_diffs[:, None] * fourier_coefs                        # [N, F]
    fourier = jnp.concatenate([jnp.sin(raw), jnp.cos(raw)], axis=1)
    out = jnp.concatenate([const_embs, fourier], axis=1)
    return out.reshape(B, -1)


if __name__ == "__main__":
    max_num_frames = 16

    key = jax.random.PRNGKey(0)
    k_t1, k_t2, k_emb = jax.random.split(key, 3)

    # deterministic synthetic parameters (nn.Embedding ~ N(0,1))
    emb_table = jax.random.normal(k_emb, (max_num_frames, D_CONST), dtype=jnp.float32)
    fourier_coefs = construct_log_spaced_freqs(max_num_frames)    # [1, 4]
    F = fourier_coefs.shape[1]

    # --- case 1: module-sized input (batch=2, 3 frames), force the Pallas path ---
    num_frames_1 = 3
    t1 = jnp.sort(jax.random.randint(k_t1, (2, num_frames_1), 0, max_num_frames),
                  axis=1).astype(jnp.float32)                     # sorted -> valid diffs
    out1 = temporal_difference_encoder(t1, emb_table, fourier_coefs, num_frames_1,
                                       sampling_type="random", min_rows_for_pallas=0)
    out1 = jax.block_until_ready(out1)
    ref1 = _reference(t1, emb_table, fourier_coefs, num_frames_1, "random")
    expected_dim = (num_frames_1 - 1) * (D_CONST + 2 * F)
    assert out1.shape == (2, expected_dim), out1.shape
    np.testing.assert_allclose(np.asarray(out1), np.asarray(ref1), rtol=1e-5, atol=1e-5)

    # --- case 2: multi-tile grid (batch=64, 9 frames -> N=512, 2 grid steps) ---
    num_frames_2 = 9
    t2 = jnp.sort(jax.random.randint(k_t2, (64, num_frames_2), 0, max_num_frames),
                  axis=1).astype(jnp.float32)
    out2 = temporal_difference_encoder(t2, emb_table, fourier_coefs, num_frames_2,
                                       sampling_type="random", min_rows_for_pallas=0)
    out2 = jax.block_until_ready(out2)
    ref2 = _reference(t2, emb_table, fourier_coefs, num_frames_2, "random")
    np.testing.assert_allclose(np.asarray(out2), np.asarray(ref2), rtol=1e-5, atol=1e-5)

    # --- case 3: uniform sampling via the default small-N fast path ---
    out3 = temporal_difference_encoder(t1, emb_table, fourier_coefs, num_frames_1,
                                       sampling_type="uniform")
    out3 = jax.block_until_ready(out3)
    ref3 = _reference(t1, emb_table, fourier_coefs, num_frames_1, "uniform")
    np.testing.assert_allclose(np.asarray(out3), np.asarray(ref3), rtol=1e-5, atol=1e-5)

    print("KERNEL_OK")
</pallas_src>

<mosaic_0001>
module attributes {stable_mosaic.version = 11 : i64} {
  func.func @kernel(%arg0: i32, %arg1: memref<8x1xf32, #tpu.memory_space<vmem>>, %arg2: memref<16x256xf32, #tpu.memory_space<vmem>>, %arg3: memref<8x264xf32, #tpu.memory_space<vmem>>) attributes {dimension_semantics = [#tpu.dimension_semantics<parallel>], iteration_bounds = array<i64: 1>, scalar_prefetch = 0 : i64, scratch_operands = 0 : i64, tpu.core_type = #tpu.core_type<tc>, window_params = [{transform_indices = @transform_0, window_bounds = array<i64: 8, 1>}, {pipeline_mode = #tpu.pipeline_mode<synchronous>, transform_indices = @transform_1, window_bounds = array<i64: 16, 256>}, {transform_indices = @transform_2, window_bounds = array<i64: 8, 264>}]} {
    %c0 = arith.constant 0 : index
    %c0_0 = arith.constant 0 : index
    %0 = vector.load %arg1[%c0, %c0_0] : memref<8x1xf32, #tpu.memory_space<vmem>>, vector<8x1xf32>
    %1 = math.roundeven %0 : vector<8x1xf32>
    %cst = arith.constant 0.000000e+00 : f32
    %cst_1 = arith.constant 1.500000e+01 : f32
    %2 = vector.broadcast %cst : f32 to vector<8x1xf32>
    %3 = arith.maximumf %2, %1 : vector<8x1xf32>
    %4 = vector.broadcast %cst_1 : f32 to vector<8x1xf32>
    %5 = arith.minimumf %4, %3 : vector<8x1xf32>
    %6 = arith.fptosi %5 : vector<8x1xf32> to vector<8x1xi32>
    %7 = tpu.iota {dimensions = array<i32: 1>} : vector<8x16xi32>
    %8 = vector.broadcast %6 : vector<8x1xi32> to vector<8x16xi32>
    %9 = arith.cmpi eq, %8, %7 : vector<8x16xi32>
    %10 = arith.extui %9 : vector<8x16xi1> to vector<8x16xi32>
    %11 = arith.sitofp %10 : vector<8x16xi32> to vector<8x16xf32>
    %c0_2 = arith.constant 0 : index
    %c0_3 = arith.constant 0 : index
    %12 = vector.load %arg2[%c0_2, %c0_3] : memref<16x256xf32, #tpu.memory_space<vmem>>, vector<16x256xf32>
    %cst_4 = arith.constant dense<0.000000e+00> : vector<8x256xf32>
    %13 = tpu.matmul %11, %12, %cst_4 {dimension_numbers = #tpu.dot_dimension_numbers<[1], [0], [0], [1], [0, 0, 1, 1], [], []>, precision = #tpu.contract_precision<fp32>} : vector<8x16xf32>, vector<16x256xf32>, vector<8x256xf32> -> vector<8x256xf32>
    %cst_5 = arith.constant 0.196349546 : f32
    %14 = vector.broadcast %cst_5 : f32 to vector<8x1xf32>
    %15 = arith.mulf %0, %14 : vector<8x1xf32>
    %cst_6 = arith.constant 0.392699093 : f32
    %16 = vector.broadcast %cst_6 : f32 to vector<8x1xf32>
    %17 = arith.mulf %0, %16 : vector<8x1xf32>
    %cst_7 = arith.constant 0.785398185 : f32
    %18 = vector.broadcast %cst_7 : f32 to vector<8x1xf32>
    %19 = arith.mulf %0, %18 : vector<8x1xf32>
    %cst_8 = arith.constant 1.57079637 : f32
    %20 = vector.broadcast %cst_8 : f32 to vector<8x1xf32>
    %21 = arith.mulf %0, %20 : vector<8x1xf32>
    %22 = tpu.concatenate %15, %17, %19, %21 in 1 : vector<8x1xf32>, vector<8x1xf32>, vector<8x1xf32>, vector<8x1xf32> -> vector<8x4xf32>
    %c0_9 = arith.constant 0 : index
    %c0_10 = arith.constant 0 : index
    %23 = vector.load %arg3[%c0_9, %c0_10] : memref<8x264xf32, #tpu.memory_space<vmem>>, vector<8x256xf32>
    tpu.vector_store %arg3[%c0_9, %c0_10], %13 {strides = array<i32>} : memref<8x264xf32, #tpu.memory_space<vmem>>, vector<8x256xf32>,
    %24 = math.sin %22 : vector<8x4xf32>
    %c0_11 = arith.constant 0 : index
    %c256 = arith.constant 256 : index
    %25 = vector.load %arg3[%c0_11, %c256] : memref<8x264xf32, #tpu.memory_space<vmem>>, vector<8x4xf32>
    tpu.vector_store %arg3[%c0_11, %c256], %24 {strides = array<i32>} : memref<8x264xf32, #tpu.memory_space<vmem>>, vector<8x4xf32>,
    %26 = math.cos %22 : vector<8x4xf32>
    %c0_12 = arith.constant 0 : index
    %c260 = arith.constant 260 : index
    %27 = vector.load %arg3[%c0_12, %c260] : memref<8x264xf32, #tpu.memory_space<vmem>>, vector<8x4xf32>
    tpu.vector_store %arg3[%c0_12, %c260], %26 {strides = array<i32>} : memref<8x264xf32, #tpu.memory_space<vmem>>, vector<8x4xf32>,
    return
  }
  func.func @transform_0(%arg0: i32) -> (i32, i32) {
    %c0_i32 = arith.constant 0 : i32
    %c0_i32_0 = arith.constant 0 : i32
    return %arg0, %c0_i32 : i32, i32
  }
  func.func @transform_1(%arg0: i32) -> (i32, i32) {
    %c0_i32 = arith.constant 0 : i32
    %c0_i32_0 = arith.constant 0 : i32
    %c0_i32_1 = arith.constant 0 : i32
    return %c0_i32, %c0_i32_0 : i32, i32
  }
  func.func @transform_2(%arg0: i32) -> (i32, i32) {
    %c0_i32 = arith.constant 0 : i32
    %c0_i32_0 = arith.constant 0 : i32
    return %arg0, %c0_i32 : i32, i32
  }
}

</mosaic_0001>

<bundles_post_ra>
// kernel: tpu_custom_call.1
= control target key start
LH: loop header
LB: loop body
LE: loop exit
PB: predicated region body
PF: predicated region fallthrough
CT: control target
= control target key end

     0   :  { %7 = vsyncpa [#allocation3], 0  ;;  %s1015_s0 = inlined_call_operand.vmem [shape: f32[8,1], index: 0, kind: input, shape index: {}]   ;;  %s1016_s1 = inlined_call_operand.hbm [shape: f32[16,256], index: 1, kind: input, shape index: {}]   ;;  %s1017_s2 = inlined_call_operand.hbm [shape: f32[8,264], index: 2, kind: output, shape index: {}]  }
   0x1   :  { %8 = vsyncpa [#allocation4], 0  ;;  %s879_s9 = smov [#allocation2]  }
   0x2   :  { %s16_s10 = sshll.u32 %s879_s9, 4  ;;  %s17_s10 = int_to_ptr.vmem [resolvable:$true] %s16_s10 }
   0x3   :  { %s843_s11 = scalar_lea.vmem %s17_s10, 512  ;;  %p848_p1 = scmp.lt.s32.totalorder %s17_s10, %s17_s10 }
   0x4   :  { %p844_p0 = scmp.ne.s32.totalorder %s17_s10, %s843_s11  ;;  %p849_p2 = scmp.lt.s32.totalorder %s843_s11, %s843_s11 }
   0x6   :  { %p850_p3 = por %p849_p2, %p848_p1 }
   0x8   :  { %p851_p4 = pnand %p850_p3, %p844_p0 }
   0xa   :  { %854 = shalt.err (!%p851_p4)
}
   0xb   :  { %s880_s12 = smov 256   ;;  %s881_s13 = smov 16  }
   0xc   :  { %22 = dma.hbm_to_vmem [thread:$0]  %s1016_s1, 512, %s17_s10, [#allocation3], %s880_s12, %s880_s12, %s881_s13  }
   0xd   :  { %875 = dma.done.wait [#allocation3], 512  }
   0xe   :  { %876 = vsyncadd [#allocation3], 4294966784  ;;  %v882_v0 = vmov 0   ;;  %v883_v1 = vmov 0.0   ;;  %v26_v2 = vld [vmem:[%s1015_s0] sm:$0xff]  ;;  %v42_v3 = vld [vmem:[#allocation2 + $0x18] sm:$0xff]  ;;  %v31_v33 = vlaneseq }
   0xf   :  { %830 = vset.pattern.permute.xlu0 %v882_v0  ;;  %211 = vmatprep.mubr.f32.mxu1 %v883_v1  ;;  %v41_v4 = vld [vmem:[#allocation2 + $0x10] sm:$0xff]  ;;  %v792_v5 = vmax.f32 %v26_v2, 0.0  ;;  %v540_v6 = vmul.f32 0.7853982, %v26_v2  ;;  %v918_v7 = vand.u32 4294901760, %v42_v3  ;;  %v40_v10 = vld [vmem:[#allocation2 + $0x8] sm:$0xff] }
  0x10   :  { %115 = vmatprep.mubr.f32.mxu0 %v883_v1  ;;  %v541_v8 = vmul.f32 1.5707964, %v26_v2  ;;  %v920_v9 = vand.u32 4294901760, %v41_v4  ;;  %v39_v11 = vld [vmem:[#allocation2] sm:$0xff]  ;;  %s884_s1 = smov 2   ;;  %v925_v14 = vand.u32 4294901760, %v40_v10 }
  0x11   :  { %v793_v12 = vmin.f32 %v792_v5, 15.0  ;;  %547 = vrot.lane.b32.xlu1 %v540_v6, %s884_s1  ;;  %v923_v13 = vsub.f32 %v42_v3, %v918_v7  ;;  %v927_v15 = vand.u32 4294901760, %v39_v11  ;;  %76 = vmatprep.subr.mxu0 %v918_v7  ;;  %v539_v22 = vmul.f32 0.3926991, %v26_v2  ;;  %s885_s0 = smov 3   ;;  %s886_s18 = smov 1  }
  0x12   :  { %v931_v16 = vsub.f32 %v41_v4, %v920_v9  ;;  %78 = vmatpush1.msra.mxu0 %v920_v9  ;;  %v936_v19 = vsub.f32 %v40_v10, %v925_v14  ;;  %v32_v34 = vand.u32 127, %v31_v33  ;;  %vm43_vm0 = vcmask 130048   ;;  %s893_s19 = smov 4   ;;  %s894_s20 = smov [#allocation5]  }
  0x13   :  { %v809_v17 = vcvt.f32.s32 %v793_v12  ;;  %v157_v18 = vand.u32 4294901760, %v923_v13  ;;  %v939_v20 = vsub.f32 %v39_v11, %v927_v15  ;;  %80 = vmatprep.subr.mxu0 %v925_v14  ;;  %v538_v37 = vmul.f32 0.19634955, %v26_v2  ;;  %s783_s21 = sshll.u32 %s894_s20, 4  ;;  %s784_s21 = int_to_ptr.vmem [resolvable:$true] %s783_s21 }
  0x14   :  { %v163_v21 = vand.u32 4294901760, %v931_v16  ;;  %82 = vmatpush1.msra.mxu0 %v927_v15  ;;  %v169_v24 = vand.u32 4294901760, %v936_v19  ;;  %vm554_vm2 = vcmask 7168   ;;  %vm556_vm3 = vcmask 15360   ;;  %s855_s22 = scalar_lea.vmem %s784_s21, 384  ;;  %p860_p6 = scmp.lt.s32.totalorder %s784_s21, %s784_s21 }
  0x15   :  { %34 = vperm.xlu0 %830, %v809_v17   ;;  %551 = vrot.lane.b32.xlu1 %v541_v8, %s885_s0  ;;  %v158_v23 = vsub.f32 %v923_v13, %v157_v18  ;;  %v175_v25 = vand.u32 4294901760, %v939_v20  ;;  %vm558_vm4 = vcmask 23552   ;;  %v887_v59 = vmov 683565275   ;;  %p856_p5 = scmp.ne.s32.totalorder %s784_s21, %s855_s22  ;;  %p861_p7 = scmp.lt.s32.totalorder %s855_s22, %s855_s22 }
  0x16   :  { %v164_v26 = vsub.f32 %v931_v16, %v163_v21  ;;  %249 = vmatprep.subr.mxu0 %v923_v13  ;;  %v170_v28 = vsub.f32 %v936_v19, %v169_v24  ;;  %v888_v61 = vmov 2475754826   ;;  %v889_v63 = vmov 2131351028  }
  0x17   :  { %v159_v27 = vand.u32 4294901760, %v158_v23  ;;  %v176_v29 = vsub.f32 %v939_v20, %v175_v25  ;;  %v891_v3 = vmov 920167782   ;;  %vm666_vm15 = vcmask 31744   ;;  %p862_p8 = por %p861_p7, %p860_p6 }
  0x18   :  { %v165_v30 = vand.u32 4294901760, %v164_v26  ;;  %v171_v31 = vand.u32 4294901760, %v170_v28 }
  0x19   :  { %543 = vrot.lane.b32.xlu0 %v539_v22, %s886_s18  ;;  %160 = vmatprep.subr.mxu1 %v159_v27  ;;  %v177_v32 = vand.u32 4294901760, %v176_v29  ;;  %p863_p9 = pnand %p862_p8, %p856_p5 }
  0x1a   :  { %166 = vmatpush1.msra.mxu1 %v165_v30 }
  0x1b   :  { %172 = vmatprep.subr.mxu1 %v171_v31 }
  0x1c   :  { %178 = vmatpush1.msra.mxu1 %v177_v32 }
  0x1d   :  { %329 = vmatprep.subr.mxu1 %v918_v7 }
  0x83   :  { %v548_v35 = vpop.permute.xlu1 %547 }
  0x87   :  { %v552_v42 = vpop.permute.xlu1 %551 }
  0x90   :  { %v35_v36 = vpop.permute.xlu0 %34 }
  0x91   :  { %vm36_vm1 = vcmp.eq.s32.totalorder %v35_v36, %v32_v34 }
  0x92   :  { %v795_v38 = vsel %vm36_vm1, 1.0, %v883_v1 }
  0x93   :  { %v45_v39 = vsel %vm43_vm0, %v795_v38, 0  ;;  %796 = vmatmul.mubr.msk.f32.vlgmr.msra.gmra.mxu1 %vm43_vm0, %v795_v38 }
  0x94   :  { %v117_v40 = vsub.f32 %v45_v39, %v45_v39  ;;  %v544_v41 = vpop.permute.xlu0 %543  ;;  %331 = vmatpush1.msra.mxu1 %v920_v9  ;;  %368 = vmatprep.mubr.f32.mxu1 %v883_v1 }
  0x95   :  { %v555_v43 = vsel %vm554_vm2, %v538_v37, %v544_v41  ;;  %333 = vmatprep.subr.mxu1 %v925_v14 }
  0x96   :  { %v557_v44 = vsel %vm556_vm3, %v555_v43, %v548_v35  ;;  %335 = vmatpush1.msra.mxu1 %v927_v15  ;;  %v118_v45 = vand.u32 4294901760, %v117_v40 }
  0x97   :  { %v967_v46 = vsel %vm558_vm4, %v557_v44, %v552_v42  ;;  %491 = vmatprep.subr.mxu1 %v918_v7 }
  0x98   :  { %v565_v47 = vand.u32 2139095040, %v967_v46  ;;  %372 = vmatmul.mubr.f32.vlgmr.msra.gmra.mxu1 %v118_v45  ;;  %v119_v48 = vsub.f32 %v117_v40, %v118_v45  ;;  %v562_v53 = vand.u32 2147483647, %v967_v46  ;;  %vm564_vm12 = vcmp.lt.s32.totalorder %v967_v46, 0 }
  0x99   :  { %493 = vmatpush1.msra.mxu1 %v920_v9  ;;  %530 = vmatprep.mubr.f32.mxu1 %v883_v1  ;;  %v892_v9 = vmov 1326507024  }
  0x9a   :  { %v566_v49 = vshrl.u32 %v565_v47, 23  ;;  %495 = vmatprep.subr.mxu1 %v925_v14  ;;  %v120_v50 = vand.u32 4294901760, %v119_v48  ;;  %v569_v56 = vand.u32 8388607, %v562_v53  ;;  %vm563_vm13 = vcmp.le.f32.partialorder %v562_v53, 0.7853982 }
  0x9b   :  { %497 = vmatpush1.msra.mxu1 %v927_v15 }
  0x9c   :  { %v799_v51 = vadd.s32 4294967169, %v566_v49  ;;  %121 = vmatmul.mubr.f32.vlgmr.msra.gmra.mxu0 %v120_v50  ;;  %798 = vmatmul.mubr.msk.f32.vlgmr.msra.gmra.mxu1 %vm43_vm0, %v795_v38  ;;  %v570_v11 = vor.u32 8388608, %v569_v56 }
  0x9d   :  { %252 = vmatpush1.msra.mxu0 %v931_v16  ;;  %291 = vmatprep.mubr.f32.mxu0 %v883_v1 }
  0x9e   :  { %v572_v52 = vadd.s32 1, %v799_v51  ;;  %255 = vmatprep.subr.mxu0 %v936_v19 }
  0x9f   :  { %258 = vmatpush1.msra.mxu0 %v939_v20 }
  0xa0   :  { %vm573_vm5 = vcmp.gt.s32.totalorder %v572_v52, 0  ;;  %409 = vmatprep.subr.mxu0 %v157_v18  ;;  %294 = vmatmul.mubr.f32.vlgmr.msra.gmra.mxu0 %v117_v40 }
  0xa1   :  { %v574_v54 = vsel %vm573_vm5, %v572_v52, 0  ;;  %413 = vmatpush1.msra.mxu0 %v163_v21  ;;  %454 = vmatprep.mubr.f32.mxu0 %v883_v1  ;;  %v890_v1 = vmov 2102212464   ;;  %vm654_vm5 = vweird.f32 %v967_v46 }
  0xa2   :  { %v576_v55 = vand.u32 31, %v574_v54  ;;  %417 = vmatprep.subr.mxu0 %v169_v24  ;;  %v575_v57 = vshrl.u32 %v574_v54, 5 }
  0xa3   :  { %421 = vmatpush1.msra.mxu0 %v175_v25  ;;  %v610_v25 = vshll.u32 %v570_v11, 8 }
  0xa4   :  { %v577_v58 = vsub.s32 32, %v576_v55  ;;  %v579_v60 = vshll.u32 %v887_v59, %v576_v55  ;;  %v582_v62 = vshll.u32 %v888_v61, %v576_v55  ;;  %v585_v0 = vshll.u32 %v889_v63, %v576_v55  ;;  %797 = vmatmul.mubr.msk.f32.vlgmr.msra.gmra.mxu0 %vm43_vm0, %v795_v38 }
  0xa5   :  { %v588_v2 = vshll.u32 %v890_v1, %v576_v55  ;;  %v591_v4 = vshll.u32 %v891_v3, %v576_v55  ;;  %vm594_vm6 = vcmp.lt.s32.totalorder %v575_v57, 1  ;;  %vm597_vm7 = vcmp.lt.s32.totalorder %v575_v57, 4 }
  0xa6   :  { %v580_v5 = vshrl.u32 %v888_v61, %v577_v58  ;;  %v583_v6 = vshrl.u32 %v889_v63, %v577_v58  ;;  %v586_v7 = vshrl.u32 %v890_v1, %v577_v58  ;;  %v589_v8 = vshrl.u32 %v891_v3, %v577_v58 }
  0xa7   :  { %v592_v10 = vshrl.u32 %v892_v9, %v577_v58  ;;  %v578_v15 = vshrl.u32 %v887_v59, %v577_v58  ;;  %vm596_vm8 = vcmp.lt.s32.totalorder %v575_v57, 3  ;;  %vm595_vm9 = vcmp.lt.s32.totalorder %v575_v57, 2 }
  0xa8   :  { %v581_v12 = vor.u32 %v580_v5, %v579_v60  ;;  %v584_v13 = vor.u32 %v583_v6, %v582_v62  ;;  %v587_v14 = vor.u32 %v586_v7, %v585_v0  ;;  %v590_v16 = vor.u32 %v589_v8, %v588_v2 }
  0xa9   :  { %v593_v17 = vor.u32 %v592_v10, %v591_v4 }
  0xaa   :  { %v599_v18 = vsel %vm597_vm7, %v587_v14, 2102212464  ;;  %v602_v19 = vsel %vm594_vm6, %v581_v12, %v584_v13  ;;  %v606_v20 = vsel %vm594_vm6, %v584_v13, %v587_v14  ;;  %v603_v21 = vsel %vm597_vm7, %v590_v16, 920167782 }
  0xab   :  { %v607_v22 = vsel %vm597_vm7, %v593_v17, 1326507024  ;;  %v604_v23 = vsel %vm596_vm8, %v587_v14, %v603_v21  ;;  %v598_v26 = vsel %vm594_vm6, %v578_v15, %v581_v12  ;;  %v600_v27 = vsel %vm596_vm8, %v584_v13, %v599_v18 }
  0xac   :  { %v608_v24 = vsel %vm596_vm8, %v590_v16, %v607_v22  ;;  %v605_v28 = vsel %vm595_vm9, %v602_v19, %v604_v23  ;;  %v601_v34 = vsel %vm595_vm9, %v598_v26, %v600_v27  ;;  %vm775_vm6 = vcmask 64544  }
  0xad   :  { %v609_v29 = vsel %vm595_vm9, %v606_v20, %v608_v24  ;;  %v999_v32 = vmul.u32.u64.low %v610_v25, %v605_v28  ;;  %v1000_v33 = vmul.u32.u64.high %v610_v25, %v605_v28, %v999_v32  ;;  %v617_v36 = vmul.u32 %v610_v25, %v601_v34 }
  0xae   :  { %v996_v30 = vmul.u32.u64.low %v610_v25, %v609_v29  ;;  %v997_v31 = vmul.u32.u64.high %v610_v25, %v609_v29, %v996_v30 }
  0xaf   :  { %v620_v35 = vadd.s32 1, %v1000_v33 }
  0xb0   :  { %vm619_vm10 = vc.u32 %v997_v31, %v999_v32  ;;  %v618_v49 = vadd.s32 %v999_v32, %v997_v31 }
  0xb1   :  { %v621_v37 = vsel %vm619_vm10, %v620_v35, %v1000_v33 }
  0xb2   :  { %v622_v38 = vadd.s32 %v621_v37, %v617_v36 }
  0xb4   :  { %v623_v39 = vadd.s32 536870912, %v622_v38 }
  0xb6   :  { %v624_v40 = vshrl.u32 %v623_v39, 30 }
  0xb8   :  { %v625_v41 = vshll.u32 %v624_v40, 30  ;;  %v648_v63 = vsub.s32 4, %v624_v40 }
  0xba   :  { %v626_v42 = vsub.s32 %v622_v38, %v625_v41  ;;  %v649_v2 = vsel %vm564_vm12, %v648_v63, %v624_v40 }
  0xbb   :  { %v651_v3 = vsel %vm563_vm13, 0, %v649_v2 }
  0xbc   :  { %v628_v43 = vsub.s32 0, %v626_v42  ;;  %v655_v4 = vadd.s32 3, %v651_v3  ;;  %v761_v6 = vand.u32 3, %v651_v3 }
  0xbe   :  { %v800_v44 = vmin.u32 %v628_v43, %v626_v42  ;;  %v656_v5 = vand.u32 3, %v655_v4  ;;  %vm766_vm0 = vcmp.eq.s32.totalorder %v761_v6, 2  ;;  %vm763_vm2 = vcmp.eq.s32.totalorder %v761_v6, 0 }
  0xbf   :  { %vm762_vm4 = vcmp.lt.s32.totalorder %v761_v6, 2 }
  0xc0   :  { %v630_v45 = vclz %v800_v44  ;;  %vm661_vm14 = vcmp.eq.s32.totalorder %v656_v5, 2  ;;  %vm658_vm1 = vcmp.eq.s32.totalorder %v656_v5, 0  ;;  %vm657_vm3 = vcmp.lt.s32.totalorder %v656_v5, 2 }
  0xc2   :  { %v801_v47 = vadd.s32 4294967294, %v630_v45 }
  0xc4   :  { %vm802_vm11 = vcmp.lt.s32.totalorder %v801_v47, 0 }
  0xc5   :  { %v633_v48 = vsel %vm802_vm11, 0, %v801_v47 }
  0xc6   :  { %v634_v50 = vsub.s32 32, %v633_v48  ;;  %v638_v51 = vsub.s32 4294967266, %v633_v48  ;;  %v635_v52 = vshll.u32 %v626_v42, %v633_v48 }
  0xc8   :  { %v636_v54 = vshrl.u32 %v618_v49, %v634_v50  ;;  %v639_v55 = vadd.s32 127, %v638_v51 }
  0xca   :  { %v637_v56 = vor.u32 %v636_v54, %v635_v52  ;;  %v640_v57 = vshll.u32 %v639_v55, 23 }
  0xcc   :  { %v641_v58 = vor.u32 4788187, %v640_v57  ;;  %v644_v60 = vcvt.s32.f32 %v637_v56 }
  0xce   :  { %v642_v59 = vand.u32 2147483647, %v641_v58 }
  0xd0   :  { %v645_v61 = vmul.f32 %v644_v60, %v642_v59 }
  0xd2   :  { %v646_v62 = vxor.u32 2147483648, %v645_v61 }
  0xd4   :  { %v647_v0 = vsel %vm564_vm12, %v646_v62, %v645_v61 }
  0xd5   :  { %v650_v1 = vsel %vm563_vm13, %v967_v46, %v647_v0 }
  0xd6   :  { %831 = vcosq.f32 %v650_v1 }
  0xd7   :  { %833 = vsinq.f32 %v650_v1 }
  0xe3   :  { %v832_v7 = vpop.eup %831 }
  0xe4   :  { %v834_v8 = vpop.eup %833  ;;  %v662_v9 = vxor.u32 2147483648, %v832_v7 }
  0xe5   :  { %v659_v10 = vxor.u32 2147483648, %v834_v8 }
  0xe6   :  { %v768_v53 = vsel %vm766_vm0, %v662_v9, %v834_v8  ;;  %v663_v11 = vsel %vm661_vm14, %v662_v9, %v834_v8 }
  0xe7   :  { %v765_v12 = vsel %vm763_vm2, %v832_v7, %v659_v10  ;;  %v660_v13 = vsel %vm658_vm1, %v832_v7, %v659_v10 }
  0xe8   :  { %v769_v14 = vsel %vm762_vm4, %v765_v12, %v768_v53  ;;  %v664_v15 = vsel %vm657_vm3, %v660_v13, %v663_v11 }
  0xe9   :  { %v770_v16 = vsel %vm654_vm5, nan, %v769_v14  ;;  %v665_v17 = vsel %vm654_vm5, nan, %v664_v15 }
  0xea   :  { %772 = vrot.lane.b32.xlu0 %v770_v16, %s893_s19  ;;  %667 = vst.msk [vmem:[#allocation5 + $0x10] sm:$0xff] %vm666_vm15, %v665_v17 }
 0x153   :  { %v214_v18 = vpop.f32.mrf.mxu1 }
 0x155   :  { %v216_v19 = vpop.f32.mrf.mxu1 }
 0x158   :  { %v373_v20 = vpop.f32.mrf.mxu1 }
 0x15a   :  { %v375_v25 = vpop.f32.mrf.mxu1 }
 0x15c   :  { %v122_v21 = vpop.f32.mrf.mxu0  ;;  %v773_v24 = vpop.permute.xlu0 %772 }
 0x15d   :  { %v215_v23 = vadd.f32 %v214_v18, %v122_v21  ;;  %776 = vst.msk [vmem:[#allocation5 + $0x10] sm:$0xff] %vm775_vm6, %v773_v24  ;;  %v533_v31 = vpop.f32.mrf.mxu1 }
 0x15e   :  { %v124_v22 = vpop.f32.mrf.mxu0 }
 0x15f   :  { %v217_v46 = vadd.f32 %v216_v19, %v124_v22  ;;  %v535_v38 = vpop.f32.mrf.mxu1 }
 0x160   :  { %v295_v26 = vpop.f32.mrf.mxu0 }
 0x161   :  { %v296_v27 = vadd.f32 %v295_v26, %v215_v23 }
 0x162   :  { %v297_v28 = vpop.f32.mrf.mxu0 }
 0x163   :  { %v298_v29 = vadd.f32 %v297_v28, %v217_v46  ;;  %v374_v30 = vadd.f32 %v373_v20, %v296_v27 }
 0x164   :  { %v457_v32 = vpop.f32.mrf.mxu0 }
 0x165   :  { %v458_v33 = vadd.f32 %v457_v32, %v374_v30  ;;  %v376_v34 = vadd.f32 %v375_v25, %v298_v29 }
 0x166   :  { %v459_v35 = vpop.f32.mrf.mxu0 }
 0x167   :  { %v534_v36 = vadd.f32 %v533_v31, %v458_v33  ;;  %v460_v37 = vadd.f32 %v459_v35, %v376_v34 }
 0x169   :  { %560 = vst [vmem:[#allocation5] sm:$0xff] %v534_v36  ;;  %v536_v39 = vadd.f32 %v535_v38, %v460_v37 }
 0x16b   :  { %561 = vst [vmem:[#allocation5 + $0x8] sm:$0xff] %v536_v39 }
 0x16c   :  { %866 = shalt.err (!%p863_p9)
}
 0x16d   :  { %786 = dma.vmem_to_hbm [thread:$0]  %s784_s21, 384, %s1017_s2, [#allocation4]  }
 0x16e   :  { %877 = dma.done.wait [#allocation4], 384  }
 0x16f   :  { %878 = vsyncadd [#allocation4], 4294966912 }
 0x170   :  { %790 = vsyncpa [#allocation3], 1 }
 0x171   :  { %791 = vsyncpa [#allocation4], 1 }

</bundles_post_ra>
